<compile_context>
chip_gen: v6e
topology: v6e:2x2x1
jax: 0.10.0
libtpu: 0.0.40
codegen_flags: <defaults>
</compile_context>

<pallas_src>
import functools

import jax
import jax.numpy as jnp
from jax import lax
from jax.experimental import pallas as pl
from jax.experimental.pallas import tpu as pltpu


# ----------------------------- fused kernel -------------------------------- #
def _fused_kernel(p_ref, wt_ref, b_ref, g_ref, bt_ref, o_ref,
                  conv_sc, sum_sc, *, eps):
    # p_ref   : (1, 9*Cin, H*W)  im2col patches for sample n (spatial on lanes)
    # wt_ref  : (Cout, 9*Cin)    transposed conv weight
    # b_ref, g_ref, bt_ref : (Cout, 1)  conv bias, BN gamma, BN beta
    # o_ref   : (Cout, N)        pooled output (written once at the last step)
    # conv_sc : (N, Cout, H*W)   VMEM-resident conv outputs for the whole batch
    # sum_sc  : (Cout, 1)        running per-channel sum over (N, H, W)
    n = pl.program_id(0)
    num_n = pl.num_programs(0)
    N, Cout, HW = conv_sc.shape

    @pl.when(n == 0)
    def _init():
        sum_sc[...] = jnp.zeros_like(sum_sc)

    # Conv2d(3x3, pad=1) for sample n as a single MXU matmul.
    conv = jnp.dot(wt_ref[...], p_ref[0], preferred_element_type=jnp.float32)
    conv = conv + b_ref[...]                               # (Cout, HW) + (Cout, 1)
    conv_sc[n] = conv
    sum_sc[...] += jnp.sum(conv, axis=1, keepdims=True)    # lane (XLU) reduction

    @pl.when(n == num_n - 1)
    def _finalize():
        count = jnp.float32(N * HW)
        mean = sum_sc[...] / count                         # (Cout, 1)

        # Centered (two-pass) variance: all conv outputs are already in VMEM,
        # so this avoids E[x^2]-E[x]^2 cancellation essentially for free.
        ssd = jnp.zeros_like(mean)
        for i in range(N):                                 # static unroll, small N
            d = conv_sc[i] - mean
            ssd = ssd + jnp.sum(d * d, axis=1, keepdims=True)
        invstd = lax.rsqrt(ssd / count + eps)
        scale = invstd * g_ref[...]                        # fold BN affine
        shift = bt_ref[...] - mean * scale

        cols = []
        for i in range(N):                                 # static unroll, small N
            y = jnp.maximum(conv_sc[i] * scale + shift, 0.0)      # BN + ReLU
            sm = jnp.sum(y, axis=1, keepdims=True) * (1.0 / HW)   # spatial mean
            # mean(y / sm) over space == mean(y) / sm == sm * (1/sm):
            # 1.0 where sm > 0, NaN where sm == 0 (matches torch 0/0 semantics).
            cols.append(sm * pl.reciprocal(sm, approx=False))
        o_ref[...] = jnp.concatenate(cols, axis=1)                # (Cout, N)


# -------------------------------- wrapper ----------------------------------- #
def my_module_forward(x_nchw, w_hwio, bias, gamma, beta, eps=1e-5):
    """x_nchw: (N, Cin, H, W) float32 -> (N, Cout, 1, 1) float32."""
    N, Cin, H, W = x_nchw.shape
    Cout = w_hwio.shape[-1]
    HW = H * W
    K9 = 9 * Cin

    x = x_nchw.astype(jnp.float32)
    x_pad = jnp.pad(x, ((0, 0), (0, 0), (1, 1), (1, 1)))   # conv padding=1

    # im2col once in XLA glue: (N, 9*Cin, H*W), K axis is tap-major / cin-minor,
    # spatial goes on the lane axis (lane-dense layout for all in-kernel work).
    taps = [x_pad[:, :, kh:kh + H, kw:kw + W].reshape(N, Cin, HW)
            for kh in range(3) for kw in range(3)]
    patches = jnp.concatenate(taps, axis=1)                 # (N, 9*Cin, HW)

    w_t = w_hwio.astype(jnp.float32).reshape(K9, Cout).T    # (Cout, 9*Cin)
    b_col = bias.astype(jnp.float32).reshape(Cout, 1)
    g_col = gamma.astype(jnp.float32).reshape(Cout, 1)
    bt_col = beta.astype(jnp.float32).reshape(Cout, 1)

    pooled_cn = pl.pallas_call(
        functools.partial(_fused_kernel, eps=float(eps)),
        grid=(N,),
        in_specs=[
            pl.BlockSpec((1, K9, HW), lambda n: (n, 0, 0)),
            pl.BlockSpec((Cout, K9), lambda n: (0, 0)),
            pl.BlockSpec((Cout, 1), lambda n: (0, 0)),
            pl.BlockSpec((Cout, 1), lambda n: (0, 0)),
            pl.BlockSpec((Cout, 1), lambda n: (0, 0)),
        ],
        out_specs=pl.BlockSpec((Cout, N), lambda n: (0, 0)),
        out_shape=jax.ShapeDtypeStruct((Cout, N), jnp.float32),
        scratch_shapes=[
            pltpu.VMEM((N, Cout, HW), jnp.float32),   # conv outputs, whole batch
            pltpu.VMEM((Cout, 1), jnp.float32),       # per-channel running sum
        ],
        compiler_params=pltpu.CompilerParams(
            # batch statistics carry across the n axis -> sequential grid
            dimension_semantics=("arbitrary",)),
    )(patches, w_t, b_col, g_col, bt_col)

    # glue: back to PyTorch output shape (N, Cout, 1, 1)
    return pooled_cn.T.reshape(N, Cout, 1, 1)


# ----------------------------- pure-JAX reference --------------------------- #
def _reference(x, w_hwio, bias, gamma, beta, eps=1e-5):
    conv = lax.conv_general_dilated(
        x.astype(jnp.float32), w_hwio.astype(jnp.float32),
        window_strides=(1, 1), padding=((1, 1), (1, 1)),
        dimension_numbers=("NCHW", "HWIO", "NCHW"),
        precision=lax.Precision.HIGHEST)
    conv = conv + bias.reshape(1, -1, 1, 1)
    mean = jnp.mean(conv, axis=(0, 2, 3), keepdims=True)
    var = jnp.mean((conv - mean) ** 2, axis=(0, 2, 3), keepdims=True)
    y = (conv - mean) * lax.rsqrt(var + eps) * gamma.reshape(1, -1, 1, 1) \
        + beta.reshape(1, -1, 1, 1)
    y = jnp.maximum(y, 0.0)
    z = y / jnp.mean(y, axis=(2, 3), keepdims=True)
    return jnp.mean(z, axis=(2, 3), keepdims=True)


if __name__ == "__main__":
    key = jax.random.PRNGKey(0)
    k_x, k_w, k_b = jax.random.split(key, 3)

    N, Cin, Cout, H, W = 2, 4, 8, 16, 16

    x = jax.random.normal(k_x, (N, Cin, H, W), dtype=jnp.float32)

    # Deterministic parameter init (Conv2d weight/bias; BN gamma=1, beta=0).
    fan_in = Cin * 3 * 3
    bound = 1.0 / jnp.sqrt(jnp.float32(fan_in))
    w_hwio = jax.random.uniform(k_w, (3, 3, Cin, Cout),
                                minval=-bound, maxval=bound, dtype=jnp.float32)
    bias = jax.random.uniform(k_b, (Cout,),
                              minval=-bound, maxval=bound, dtype=jnp.float32)
    gamma = jnp.ones((Cout,), jnp.float32)
    beta = jnp.zeros((Cout,), jnp.float32)

    out = my_module_forward(x, w_hwio, bias, gamma, beta)
    out = jax.block_until_ready(out)

    ref = jax.block_until_ready(_reference(x, w_hwio, bias, gamma, beta))

    assert out.shape == (N, Cout, 1, 1)
    assert jnp.allclose(out, ref, rtol=1e-3, atol=1e-3, equal_nan=True)
    print("KERNEL_OK")
</pallas_src>

<mosaic_0001>
module attributes {stable_mosaic.version = 11 : i64} {
  func.func @_fused_kernel(%arg0: i32, %arg1: memref<1x36x256xf32, #tpu.memory_space<vmem>>, %arg2: memref<8x36xf32, #tpu.memory_space<vmem>>, %arg3: memref<8x1xf32, #tpu.memory_space<vmem>>, %arg4: memref<8x1xf32, #tpu.memory_space<vmem>>, %arg5: memref<8x1xf32, #tpu.memory_space<vmem>>, %arg6: memref<8x2xf32, #tpu.memory_space<vmem>>, %arg7: memref<2x8x256xf32, #tpu.memory_space<vmem>>, %arg8: memref<8x1xf32, #tpu.memory_space<vmem>>) attributes {dimension_semantics = [#tpu.dimension_semantics<arbitrary>], iteration_bounds = array<i64: 2>, scalar_prefetch = 0 : i64, scratch_operands = 2 : i64, tpu.core_type = #tpu.core_type<tc>, window_params = [{transform_indices = @transform_0, window_bounds = array<i64: 1, 36, 256>}, {pipeline_mode = #tpu.pipeline_mode<synchronous>, transform_indices = @transform_1, window_bounds = array<i64: 8, 36>}, {pipeline_mode = #tpu.pipeline_mode<synchronous>, transform_indices = @transform_2, window_bounds = array<i64: 8, 1>}, {pipeline_mode = #tpu.pipeline_mode<synchronous>, transform_indices = @transform_3, window_bounds = array<i64: 8, 1>}, {pipeline_mode = #tpu.pipeline_mode<synchronous>, transform_indices = @transform_4, window_bounds = array<i64: 8, 1>}, {pipeline_mode = #tpu.pipeline_mode<synchronous>, transform_indices = @transform_5, window_bounds = array<i64: 8, 2>}]} {
    %c0_i32 = arith.constant 0 : i32
    %0 = arith.cmpi eq, %arg0, %c0_i32 : i32
    %1 = arith.extui %0 : i1 to i32
    %c0_i32_0 = arith.constant 0 : i32
    %2 = arith.cmpi ne, %1, %c0_i32_0 : i32
    scf.if %2 {
      %cst_15 = arith.constant 0.000000e+00 : f32
      %22 = vector.broadcast %cst_15 : f32 to vector<8x1xf32>
      %c0_16 = arith.constant 0 : index
      %c0_17 = arith.constant 0 : index
      %23 = vector.load %arg8[%c0_16, %c0_17] : memref<8x1xf32, #tpu.memory_space<vmem>>, vector<8x1xf32>
      tpu.vector_store %arg8[%c0_16, %c0_17], %22 {strides = array<i32>} : memref<8x1xf32, #tpu.memory_space<vmem>>, vector<8x1xf32>,
    } else {
    }
    %c0 = arith.constant 0 : index
    %c0_1 = arith.constant 0 : index
    %3 = vector.load %arg2[%c0, %c0_1] : memref<8x36xf32, #tpu.memory_space<vmem>>, vector<8x36xf32>
    %c0_2 = arith.constant 0 : index
    %c0_3 = arith.constant 0 : index
    %c0_4 = arith.constant 0 : index
    %4 = vector.load %arg1[%c0_2, %c0_3, %c0_4] : memref<1x36x256xf32, #tpu.memory_space<vmem>>, vector<1x36x256xf32>
    %5 = vector.shape_cast %4 : vector<1x36x256xf32> to vector<36x256xf32>
    %cst = arith.constant dense<0.000000e+00> : vector<8x256xf32>
    %6 = tpu.matmul %3, %5, %cst {dimension_numbers = #tpu.dot_dimension_numbers<[1], [0], [0], [1], [0, 0, 1, 1], [], []>} : vector<8x36xf32>, vector<36x256xf32>, vector<8x256xf32> -> vector<8x256xf32>
    %c0_5 = arith.constant 0 : index
    %c0_6 = arith.constant 0 : index
    %7 = vector.load %arg3[%c0_5, %c0_6] : memref<8x1xf32, #tpu.memory_space<vmem>>, vector<8x1xf32>
    %8 = vector.broadcast %7 : vector<8x1xf32> to vector<8x256xf32>
    %9 = arith.addf %6, %8 : vector<8x256xf32>
    %10 = arith.index_cast %arg0 : i32 to index
    %c0_7 = arith.constant 0 : index
    %c0_8 = arith.constant 0 : index
    %11 = vector.load %arg7[%10, %c0_7, %c0_8] : memref<2x8x256xf32, #tpu.memory_space<vmem>>, vector<1x8x256xf32>
    %12 = vector.shape_cast %11 : vector<1x8x256xf32> to vector<8x256xf32>
    %13 = vector.shape_cast %9 : vector<8x256xf32> to vector<1x8x256xf32>
    tpu.vector_store %arg7[%10, %c0_7, %c0_8], %13 {strides = array<i32>} : memref<2x8x256xf32, #tpu.memory_space<vmem>>, vector<1x8x256xf32>,
    %c0_9 = arith.constant 0 : index
    %c0_10 = arith.constant 0 : index
    %14 = vector.load %arg8[%c0_9, %c0_10] : memref<8x1xf32, #tpu.memory_space<vmem>>, vector<8x1xf32>
    %cst_11 = arith.constant dense<0.000000e+00> : vector<8xf32>
    %15 = vector.multi_reduction <add>, %9, %cst_11 [1] : vector<8x256xf32> to vector<8xf32>
    %16 = vector.shape_cast %15 : vector<8xf32> to vector<8x1xf32>
    %17 = arith.addf %14, %16 : vector<8x1xf32>
    %c0_12 = arith.constant 0 : index
    %c0_13 = arith.constant 0 : index
    %18 = vector.load %arg8[%c0_12, %c0_13] : memref<8x1xf32, #tpu.memory_space<vmem>>, vector<8x1xf32>
    tpu.vector_store %arg8[%c0_12, %c0_13], %17 {strides = array<i32>} : memref<8x1xf32, #tpu.memory_space<vmem>>, vector<8x1xf32>,
    %c1_i32 = arith.constant 1 : i32
    %19 = arith.cmpi eq, %arg0, %c1_i32 : i32
    %20 = arith.extui %19 : i1 to i32
    %c0_i32_14 = arith.constant 0 : i32
    %21 = arith.cmpi ne, %20, %c0_i32_14 : i32
    scf.if %21 {
      %c0_15 = arith.constant 0 : index
      %c0_16 = arith.constant 0 : index
      %22 = vector.load %arg8[%c0_15, %c0_16] : memref<8x1xf32, #tpu.memory_space<vmem>>, vector<8x1xf32>
      %cst_17 = arith.constant 5.120000e+02 : f32
      %23 = vector.broadcast %cst_17 : f32 to vector<8x1xf32>
      %24 = arith.divf %22, %23 : vector<8x1xf32>
      %cst_18 = arith.constant 0.000000e+00 : f32
      %25 = vector.broadcast %cst_18 : f32 to vector<8x1xf32>
      %c0_19 = arith.constant 0 : index
      %c0_20 = arith.constant 0 : index
      %c0_21 = arith.constant 0 : index
      %26 = vector.load %arg7[%c0_19, %c0_20, %c0_21] : memref<2x8x256xf32, #tpu.memory_space<vmem>>, vector<1x8x256xf32>
      %27 = vector.shape_cast %26 : vector<1x8x256xf32> to vector<8x256xf32>
      %28 = vector.broadcast %24 : vector<8x1xf32> to vector<8x256xf32>
      %29 = arith.subf %27, %28 : vector<8x256xf32>
      %30 = arith.mulf %29, %29 : vector<8x256xf32>
      %cst_22 = arith.constant dense<0.000000e+00> : vector<8xf32>
      %31 = vector.multi_reduction <add>, %30, %cst_22 [1] : vector<8x256xf32> to vector<8xf32>
      %32 = vector.shape_cast %31 : vector<8xf32> to vector<8x1xf32>
      %33 = arith.addf %25, %32 : vector<8x1xf32>
      %c1 = arith.constant 1 : index
      %c0_23 = arith.constant 0 : index
      %c0_24 = arith.constant 0 : index
      %34 = vector.load %arg7[%c1, %c0_23, %c0_24] : memref<2x8x256xf32, #tpu.memory_space<vmem>>, vector<1x8x256xf32>
      %35 = vector.shape_cast %34 : vector<1x8x256xf32> to vector<8x256xf32>
      %36 = vector.broadcast %24 : vector<8x1xf32> to vector<8x256xf32>
      %37 = arith.subf %35, %36 : vector<8x256xf32>
      %38 = arith.mulf %37, %37 : vector<8x256xf32>
      %cst_25 = arith.constant dense<0.000000e+00> : vector<8xf32>
      %39 = vector.multi_reduction <add>, %38, %cst_25 [1] : vector<8x256xf32> to vector<8xf32>
      %40 = vector.shape_cast %39 : vector<8xf32> to vector<8x1xf32>
      %41 = arith.addf %33, %40 : vector<8x1xf32>
      %cst_26 = arith.constant 5.120000e+02 : f32
      %42 = vector.broadcast %cst_26 : f32 to vector<8x1xf32>
      %43 = arith.divf %41, %42 : vector<8x1xf32>
      %cst_27 = arith.constant 9.99999974E-6 : f32
      %44 = vector.broadcast %cst_27 : f32 to vector<8x1xf32>
      %45 = arith.addf %43, %44 : vector<8x1xf32>
      %46 = math.rsqrt %45 : vector<8x1xf32>
      %c0_28 = arith.constant 0 : index
      %c0_29 = arith.constant 0 : index
      %47 = vector.load %arg4[%c0_28, %c0_29] : memref<8x1xf32, #tpu.memory_space<vmem>>, vector<8x1xf32>
      %48 = arith.mulf %46, %47 : vector<8x1xf32>
      %c0_30 = arith.constant 0 : index
      %c0_31 = arith.constant 0 : index
      %49 = vector.load %arg5[%c0_30, %c0_31] : memref<8x1xf32, #tpu.memory_space<vmem>>, vector<8x1xf32>
      %50 = arith.mulf %24, %48 : vector<8x1xf32>
      %51 = arith.subf %49, %50 : vector<8x1xf32>
      %c0_32 = arith.constant 0 : index
      %c0_33 = arith.constant 0 : index
      %c0_34 = arith.constant 0 : index
      %52 = vector.load %arg7[%c0_32, %c0_33, %c0_34] : memref<2x8x256xf32, #tpu.memory_space<vmem>>, vector<1x8x256xf32>
      %53 = vector.shape_cast %52 : vector<1x8x256xf32> to vector<8x256xf32>
      %54 = vector.broadcast %48 : vector<8x1xf32> to vector<8x256xf32>
      %55 = arith.mulf %53, %54 : vector<8x256xf32>
      %56 = vector.broadcast %51 : vector<8x1xf32> to vector<8x256xf32>
      %57 = arith.addf %55, %56 : vector<8x256xf32>
      %cst_35 = arith.constant 0.000000e+00 : f32
      %58 = vector.broadcast %cst_35 : f32 to vector<8x256xf32>
      %59 = arith.maximumf %57, %58 : vector<8x256xf32>
      %cst_36 = arith.constant dense<0.000000e+00> : vector<8xf32>
      %60 = vector.multi_reduction <add>, %59, %cst_36 [1] : vector<8x256xf32> to vector<8xf32>
      %61 = vector.shape_cast %60 : vector<8xf32> to vector<8x1xf32>
      %cst_37 = arith.constant 3.906250e-03 : f32
      %62 = vector.broadcast %cst_37 : f32 to vector<8x1xf32>
      %63 = arith.mulf %61, %62 : vector<8x1xf32>
      %64 = tpu.reciprocal %63 : vector<8x1xf32> -> vector<8x1xf32>
      %65 = arith.mulf %63, %64 : vector<8x1xf32>
      %c1_38 = arith.constant 1 : index
      %c0_39 = arith.constant 0 : index
      %c0_40 = arith.constant 0 : index
      %66 = vector.load %arg7[%c1_38, %c0_39, %c0_40] : memref<2x8x256xf32, #tpu.memory_space<vmem>>, vector<1x8x256xf32>
      %67 = vector.shape_cast %66 : vector<1x8x256xf32> to vector<8x256xf32>
      %68 = vector.broadcast %48 : vector<8x1xf32> to vector<8x256xf32>
      %69 = arith.mulf %67, %68 : vector<8x256xf32>
      %70 = vector.broadcast %51 : vector<8x1xf32> to vector<8x256xf32>
      %71 = arith.addf %69, %70 : vector<8x256xf32>
      %cst_41 = arith.constant 0.000000e+00 : f32
      %72 = vector.broadcast %cst_41 : f32 to vector<8x256xf32>
      %73 = arith.maximumf %71, %72 : vector<8x256xf32>
      %cst_42 = arith.constant dense<0.000000e+00> : vector<8xf32>
      %74 = vector.multi_reduction <add>, %73, %cst_42 [1] : vector<8x256xf32> to vector<8xf32>
      %75 = vector.shape_cast %74 : vector<8xf32> to vector<8x1xf32>
      %cst_43 = arith.constant 3.906250e-03 : f32
      %76 = vector.broadcast %cst_43 : f32 to vector<8x1xf32>
      %77 = arith.mulf %75, %76 : vector<8x1xf32>
      %78 = tpu.reciprocal %77 : vector<8x1xf32> -> vector<8x1xf32>
      %79 = arith.mulf %77, %78 : vector<8x1xf32>
      %80 = tpu.concatenate %65, %79 in 1 : vector<8x1xf32>, vector<8x1xf32> -> vector<8x2xf32>
      %c0_44 = arith.constant 0 : index
      %c0_45 = arith.constant 0 : index
      %81 = vector.load %arg6[%c0_44, %c0_45] : memref<8x2xf32, #tpu.memory_space<vmem>>, vector<8x2xf32>
      tpu.vector_store %arg6[%c0_44, %c0_45], %80 {strides = array<i32>} : memref<8x2xf32, #tpu.memory_space<vmem>>, vector<8x2xf32>,
    } else {
    }
    return
  }
  func.func @transform_0(%arg0: i32) -> (i32, i32, i32) {
    %c0_i32 = arith.constant 0 : i32
    %c0_i32_0 = arith.constant 0 : i32
    %c0_i32_1 = arith.constant 0 : i32
    return %arg0, %c0_i32, %c0_i32_0 : i32, i32, i32
  }
  func.func @transform_1(%arg0: i32) -> (i32, i32) {
    %c0_i32 = arith.constant 0 : i32
    %c0_i32_0 = arith.constant 0 : i32
    %c0_i32_1 = arith.constant 0 : i32
    return %c0_i32, %c0_i32_0 : i32, i32
  }
  func.func @transform_2(%arg0: i32) -> (i32, i32) {
    %c0_i32 = arith.constant 0 : i32
    %c0_i32_0 = arith.constant 0 : i32
    %c0_i32_1 = arith.constant 0 : i32
    return %c0_i32, %c0_i32_0 : i32, i32
  }
  func.func @transform_3(%arg0: i32) -> (i32, i32) {
    %c0_i32 = arith.constant 0 : i32
    %c0_i32_0 = arith.constant 0 : i32
    %c0_i32_1 = arith.constant 0 : i32
    return %c0_i32, %c0_i32_0 : i32, i32
  }
  func.func @transform_4(%arg0: i32) -> (i32, i32) {
    %c0_i32 = arith.constant 0 : i32
    %c0_i32_0 = arith.constant 0 : i32
    %c0_i32_1 = arith.constant 0 : i32
    return %c0_i32, %c0_i32_0 : i32, i32
  }
  func.func @transform_5(%arg0: i32) -> (i32, i32) {
    %c0_i32 = arith.constant 0 : i32
    %c0_i32_0 = arith.constant 0 : i32
    %c0_i32_1 = arith.constant 0 : i32
    return %c0_i32, %c0_i32_0 : i32, i32
  }
}

</mosaic_0001>

<bundles_post_ra>
// kernel: tpu_custom_call.1
= control target key start
LH: loop header
LB: loop body
LE: loop exit
PB: predicated region body
PF: predicated region fallthrough
CT: control target
= control target key end

     0   :  { %s514_s18 = smov 0   ;;  %s552_s0 = inlined_call_operand.vmem [shape: f32[2,36,256], index: 0, kind: input, shape index: {}]   ;;  %s553_s1 = inlined_call_operand.vmem [shape: f32[8,36], index: 1, kind: input, shape index: {}]   ;;  %s554_s2 = inlined_call_operand.vmem [shape: f32[8,1], index: 2, kind: input, shape index: {}]   ;;  %s555_s3 = inlined_call_operand.vmem [shape: f32[8,1], index: 3, kind: input, shape index: {}]   ;;  %s556_s4 = inlined_call_operand.vmem [shape: f32[8,1], index: 4, kind: input, shape index: {}]   ;;  %s557_s5 = inlined_call_operand.vmem [shape: f32[8,2], index: 5, kind: output, shape index: {}]  }
   0x1 LB: > { %s520_s19 = sadd.s32 4294967295, %s478_s18   ;;  %p438_p0 = scmp.ge.s32.totalorder %s478_s18, 1  ;;  %s478_s18 = sphi %s514_s18, %s15_s18  }
   0x2   : > { %p182_p1 = scmp.lt.s32.totalorder %s478_s18, 3 }
   0x4   : > { %p183_p2 = pnand %p438_p0, %p182_p1 }
   0x5   : > { %p205_p3 = scmp.lt.s32.totalorder (!%p183_p2), %s520_s19, 1  ;;  %p440_p4 = scmp.ne.s32.totalorder (!%p183_p2), %s520_s19, 0 }
   0x6   : > { %186 = sbr.rel (%p183_p2) target bundleno = 962 (0x3c2), region = 40 }
   0xb   : > { %s206_s20 = scalar_select %p205_p3, %s520_s19, 1 }
   0xc   : > { %213 = sbr.rel (%p440_p4) target bundleno = 19 (0x13), region = 44 }
   0xd   : > { %s450_s21 = smul.u32 80, %s206_s20 }
   0xf   : > { %s209_s24 = scalar_lea.vmem %s552_s0, %s450_s21 }
  0x11   : > { %vm214_vm0 = vcmask 7168   ;;  %v480_v0 = vmov 0.0  }
  0x12   : > { %215 = vst.msk [vmem:[#allocation3] sm:$0xff] %vm214_vm0, %v480_v0 }
  0x13 PF: > { %v226_v1 = vld [vmem:[%s209_s24 + $0x48] sm:$0xf]  ;;  %vm237_vm1 = vcmask 1043456   ;;  %v225_v2 = vld [vmem:[%s209_s24 + $0x40] sm:$0xf]  ;;  %v224_v3 = vld [vmem:[%s209_s24 + $0x38] sm:$0xff] }
  0x14   : > { %441 = vmatprep.subr.msk.mxu0 %vm237_vm1, %v226_v1  ;;  %v223_v4 = vld [vmem:[%s209_s24 + $0x30] sm:$0xff]  ;;  %v222_v5 = vld [vmem:[%s209_s24 + $0x28] sm:$0xff]  ;;  %v481_v6 = vmov 0.0   ;;  %v221_v7 = vld [vmem:[%s209_s24 + $0x20] sm:$0xff]  ;;  %v482_v8 = vmov 0   ;;  %vm233_vm2 = vcmask 293888  }
  0x15   : > { %442 = vmatpush1.msk.msra.mxu0 %vm237_vm1, %v225_v2  ;;  %308 = vmatprep.mubr.f32.mxu0 %v481_v6  ;;  %v227_v9 = vld [vmem:[%s554_s2] sm:$0xff]  ;;  %v220_v10 = vld [vmem:[%s209_s24 + $0x18] sm:$0xff]  ;;  %v219_v11 = vld [vmem:[%s209_s24 + $0x10] sm:$0xff]  ;;  %s449_s29 = sshll.u32 %s520_s19, 4  ;;  %vm325_vm3 = vcmask 7168   ;;  %p446_p5 = scmp.ne.s32.totalorder %s520_s19, 1 }
  0x16   : > { %268 = vmatprep.subr.mxu0 %v224_v3  ;;  %463 = vset.pattern.permute.xlu0 %v482_v8  ;;  %v218_v12 = vld [vmem:[%s209_s24 + $0x8] sm:$0xff]  ;;  %v217_v13 = vld [vmem:[%s209_s24] sm:$0xff]  ;;  %s317_s30 = scalar_lea.vmem [#allocation2], %s449_s29 }
  0x17   : > { %269 = vmatpush1.msra.mxu0 %v223_v4  ;;  %230 = vperm.xlu0 %463, %v227_v9   ;;  %v216_v14 = vld [vmem:[%s553_s1] sm:$0xff] }
  0x18   : > { %270 = vmatprep.subr.mxu0 %v222_v5 }
  0x19   : > { %271 = vmatpush1.msra.mxu0 %v221_v7  ;;  %v320_v21 = vld [vmem:[#allocation3] sm:$0xff] }
  0x1a   : > { %272 = vmatprep.subr.mxu0 %v220_v10 }
  0x1b   : > { %273 = vmatpush1.msra.mxu0 %v219_v11 }
  0x1c   : > { %274 = vmatprep.subr.mxu0 %v218_v12 }
  0x1d   : > { %275 = vmatpush1.msra.mxu0 %v217_v13 }
  0x1e   : > { %443 = vmatmul.mubr.msk.f32.vlgmr.msra.gmra.mxu0 %vm233_vm2, %v216_v14 }
  0x92   : > { %v231_v15 = vpop.permute.xlu0 %230 }
  0xde   : > { %v310_v16 = vpop.f32.mrf.mxu0 }
  0xdf   : > { %v311_v17 = vadd.f32 %v310_v16, %v231_v15 }
  0xe0   : > { %v312_v18 = vpop.f32.mrf.mxu0 }
  0xe1   : > { %318 = vst [vmem:[%s317_s30] sm:$0xff] %v311_v17  ;;  %v313_v19 = vadd.f32 %v312_v18, %v231_v15 }
  0xe3   : > { %319 = vst [vmem:[%s317_s30 + $0x8] sm:$0xff] %v313_v19  ;;  %v321_v20 = vadd.f32 %v313_v19, %v311_v17 }
  0xe5   : > { %322 = vadd.xlane.f32.xlu0 %v321_v20 }
 0x16d   : > { %330 = sbr.rel (%p446_p5) target bundleno = 962 (0x3c2), region = 48 }
 0x16e   : > { %v323_v22 = vpop.xlane.xlu0 %322 }
 0x16f   : > { %v324_v23 = vadd.f32 %v323_v22, %v320_v21 }
 0x171   : > { %326 = vst.msk [vmem:[#allocation3] sm:$0xff] %vm325_vm3, %v324_v23 }
 0x172   : > { %v483_v25 = vmov 0   ;;  %v350_v27 = vld [vmem:[#allocation2 + $0x10] sm:$0xff]  ;;  %v351_v28 = vld [vmem:[#allocation2 + $0x18] sm:$0xff]  ;;  %v334_v29 = vld [vmem:[#allocation2] sm:$0xff]  ;;  %vm403_vm4 = vcmask 15360  }
 0x173   : > { %464 = vset.pattern.permute.xlu0 %v483_v25  ;;  %465 = vset.pattern.permute.xlu1 %v483_v25  ;;  %v335_v30 = vld [vmem:[#allocation2 + $0x8] sm:$0xff]  ;;  %v363_v47 = vld [vmem:[%s555_s3] sm:$0xff] }
 0x174   : > { %v365_v50 = vld [vmem:[%s556_s4] sm:$0xff] }
 0x178   : > { %v331_v24 = vld [vmem:[#allocation3] sm:$0xff] }
 0x179   : > { %v333_v26 = vmul.f32 0.001953125, %v331_v24 }
 0x17b   : > { %338 = vperm.xlu0 %464, %v333_v26  }
 0x1f6   : > { %v339_v31 = vpop.permute.xlu0 %338 }
 0x1f7   : > { %v352_v32 = vsub.f32 %v350_v27, %v339_v31  ;;  %v353_v33 = vsub.f32 %v351_v28, %v339_v31  ;;  %v341_v34 = vsub.f32 %v334_v29, %v339_v31  ;;  %v342_v35 = vsub.f32 %v335_v30, %v339_v31 }
 0x1f9   : > { %v354_v36 = vmul.f32 %v352_v32, %v352_v32  ;;  %v355_v37 = vmul.f32 %v353_v33, %v353_v33  ;;  %v343_v38 = vmul.f32 %v341_v34, %v341_v34  ;;  %v344_v39 = vmul.f32 %v342_v35, %v342_v35 }
 0x1fb   : > { %v356_v40 = vadd.f32 %v355_v37, %v354_v36  ;;  %v345_v41 = vadd.f32 %v344_v39, %v343_v38 }
 0x1fd   : > { %357 = vadd.xlane.f32.xlu1 %v356_v40  ;;  %346 = vadd.xlane.f32.xlu0 %v345_v41 }
 0x286   : > { %v358_v42 = vpop.xlane.xlu1 %357  ;;  %v347_v43 = vpop.xlane.xlu0 %346 }
 0x287   : > { %v359_v44 = vadd.f32 %v358_v42, %v347_v43 }
 0x289   : > { %v360_v45 = vmul.f32 0.001953125, %v359_v44 }
 0x28b   : > { %v361_v46 = vadd.f32 1e-05, %v360_v45 }
 0x28d   : > { %466 = vrsqrt.f32 %v361_v46 }
 0x29a   : > { %v467_v48 = vpop.eup %466 }
 0x29b   : > { %v364_v49 = vmul.f32 %v467_v48, %v363_v47 }
 0x29d   : > { %370 = vperm.xlu1 %465, %v364_v49   ;;  %v366_v51 = vmul.f32 %v364_v49, %v333_v26 }
 0x29f   : > { %v367_v52 = vsub.f32 %v365_v50, %v366_v51 }
 0x2a1   : > { %377 = vperm.xlu1 %465, %v367_v52  }
 0x318   : > { %v371_v53 = vpop.permute.xlu1 %370 }
 0x319   : > { %v373_v54 = vmul.f32 %v371_v53, %v334_v29  ;;  %v374_v55 = vmul.f32 %v371_v53, %v335_v30  ;;  %v390_v56 = vmul.f32 %v371_v53, %v350_v27  ;;  %v391_v57 = vmul.f32 %v371_v53, %v351_v28 }
 0x31c   : > { %v378_v58 = vpop.permute.xlu1 %377 }
 0x31d   : > { %v380_v59 = vadd.f32 %v378_v58, %v373_v54  ;;  %v381_v60 = vadd.f32 %v378_v58, %v374_v55  ;;  %v392_v61 = vadd.f32 %v390_v56, %v378_v58  ;;  %v393_v62 = vadd.f32 %v391_v57, %v378_v58 }
 0x31f   : > { %v382_v63 = vmax.f32 %v380_v59, 0.0  ;;  %v383_v0 = vmax.f32 %v381_v60, 0.0  ;;  %v394_v1 = vmax.f32 %v392_v61, 0.0  ;;  %v395_v2 = vmax.f32 %v393_v62, 0.0 }
 0x321   : > { %v384_v3 = vadd.f32 %v383_v0, %v382_v63  ;;  %v396_v4 = vadd.f32 %v395_v2, %v394_v1 }
 0x323   : > { %385 = vadd.xlane.f32.xlu1 %v384_v3  ;;  %397 = vadd.xlane.f32.xlu0 %v396_v4 }
 0x3ac   : > { %v386_v5 = vpop.xlane.xlu1 %385  ;;  %v398_v6 = vpop.xlane.xlu0 %397 }
 0x3ad   : > { %v387_v7 = vmul.f32 0.00390625, %v386_v5  ;;  %v399_v8 = vmul.f32 0.00390625, %v398_v6 }
 0x3af   : > { %468 = vrcp.f32 %v387_v7 }
 0x3b0   : > { %470 = vrcp.f32 %v399_v8 }
 0x3bc   : > { %v469_v9 = vpop.eup %468 }
 0x3bd   : > { %v471_v10 = vpop.eup %470  ;;  %v389_v11 = vmul.f32 %v469_v9, %v387_v7 }
 0x3be   : > { %v401_v12 = vmul.f32 %v471_v10, %v399_v8 }
 0x3c0   : > { %v402_v13 = vsel %vm325_vm3, %v389_v11, %v401_v12 }
 0x3c1   : > { %404 = vst.msk [vmem:[%s557_s5] sm:$0xff] %vm403_vm4, %v402_v13 }
 0x3c2 PF: > { %s15_s18 = sadd.s32 1, %s478_s18  }
 0x3c3   : > { %p12_p6 = scmp.ge.s32.totalorder %s15_s18, 4  }
 0x3c5   :  { %14 = sbr.rel (!%p12_p6) target bundleno = 1 (0x1), region = 76 }

</bundles_post_ra>
